<compile_context>
chip_gen: v5e
topology: v5e:2x2
jax: 0.10.0
libtpu: 0.0.40
codegen_flags: <defaults>
</compile_context>

<pallas_src>
import functools

import jax
import jax.numpy as jnp
from jax.experimental import pallas as pl
from jax.experimental.pallas import tpu as pltpu

_MIB = 1024 * 1024


def _layernorm_kernel(x_ref, w_ref, b_ref, o_ref, *, eps, h_actual):
    # x_ref: (block_rows, Hp) tile in VMEM; w_ref/b_ref: (1, Hp) broadcast params.
    # Padded lanes (if any) contain zeros, so dividing by the true H keeps mean/var exact.
    x = x_ref[...].astype(jnp.float32)
    inv_h = 1.0 / h_actual
    s = jnp.sum(x, axis=-1, keepdims=True)           # row sum        (XLU reduce)
    s2 = jnp.sum(x * x, axis=-1, keepdims=True)      # row sum-of-sq  (1 VALU pass + reduce)
    mean = s * inv_h
    var = jnp.maximum(s2 * inv_h - mean * mean, 0.0)  # clamp guards E[x^2]-mean^2 cancellation
    inv = jax.lax.rsqrt(var + eps)                    # per-row scalar, EUP slot (free-ish)
    # Fused normalization: x is never centered in-place -> only ONE live full-tile f32 temp.
    xhat = x * inv + (-mean * inv)
    y = w_ref[...].astype(jnp.float32) * xhat + b_ref[...].astype(jnp.float32)
    o_ref[...] = y.astype(o_ref.dtype)


def _tpu_vmem_and_cores():
    """(per-core VMEM bytes, num TensorCores) with conservative fallbacks."""
    vmem_cap = 64 * _MIB  # conservative default = v7x per-TC physical VMEM
    num_tc = 1
    try:
        vmem_cap = int(pltpu.get_tpu_info().vmem_capacity_bytes)
    except Exception:
        pass
    try:
        kind = jax.devices()[0].device_kind.lower()
        if "v7" in kind:
            num_tc = 2
    except Exception:
        pass
    return vmem_cap, num_tc


def _pick_block_rows_and_vmem(rows, hp, in_dtype, out_dtype,
                              target_tile_bytes=2 * _MIB):
    """Row-tile size + vmem limit from the FULL working set (not just input bytes)."""
    isz = jnp.dtype(in_dtype).itemsize
    osz = jnp.dtype(out_dtype).itemsize
    sublane = {4: 8, 2: 16, 1: 32}.get(isz, 8)

    vmem_cap, num_tc = _tpu_vmem_and_cores()

    # Working-set budget: ~24 MiB on 64-MiB-VMEM chips (v7x), ~40 MiB on 128-MiB chips.
    budget = min(vmem_cap // 2 - 8 * _MIB, 40 * _MIB)
    budget = max(budget, 4 * _MIB)

    # 2x double-buffered input + 2x double-buffered output + ~2 live f32 full-tile temps.
    per_row_ws = hp * (2 * isz + 2 * osz + 2 * 4)
    per_row_in = hp * isz

    br_budget = max(sublane, (budget // per_row_ws) // sublane * sublane)
    br_target = max(sublane, (target_tile_bytes // per_row_in) // sublane * sublane)
    br = min(br_budget, br_target)

    # Dual-TC v7x: keep enough grid steps for both cores. Single-TC v5e/v6e: prefer
    # bigger tiles (per-step overhead ~0.35us dominates small mem-bound inputs).
    min_grid_steps = 8 if num_tc >= 2 else 2
    if rows >= min_grid_steps * sublane:
        cap = max(sublane, (rows // min_grid_steps) // sublane * sublane)
        br = min(br, cap)

    padded_rows = pl.cdiv(rows, sublane) * sublane
    br = min(br, padded_rows)

    # TODO(synk): for very large hidden (sublane*Hp working set > budget) fall back to a
    # chunked-H two-pass accumulation kernel instead of a single full-H row tile.

    footprint = br * per_row_ws + 4 * hp * 4  # + double-buffered (1,Hp) params as f32
    cap_limit = 48 * _MIB if vmem_cap <= 64 * _MIB else 64 * _MIB
    vmem_limit = int(min(cap_limit, max(footprint + 4 * _MIB, 16 * _MIB)))
    return br, vmem_limit


def layer_norm(x, weight, bias, *, eps=1e-5, block_rows=None):
    """x: (..., H). weight/bias: (H,). Normalizes over the last axis."""
    orig_shape = x.shape
    H = orig_shape[-1]
    x2 = x.reshape(-1, H)
    rows = x2.shape[0]

    # Lane-dense padding: make the last dim a 128-multiple so stores are unmasked vst.
    Hp = pl.cdiv(H, 128) * 128
    if Hp != H:
        pad = Hp - H
        x2 = jnp.pad(x2, ((0, 0), (0, pad)))
        w2 = jnp.pad(weight.reshape(1, H), ((0, 0), (0, pad)))
        b2 = jnp.pad(bias.reshape(1, H), ((0, 0), (0, pad)))
    else:
        w2 = weight.reshape(1, H)
        b2 = bias.reshape(1, H)

    picked_br, vmem_limit = _pick_block_rows_and_vmem(rows, Hp, x.dtype, x.dtype)
    if block_rows is None:
        block_rows = picked_br

    kernel = functools.partial(_layernorm_kernel, eps=eps, h_actual=float(H))
    grid = (pl.cdiv(rows, block_rows),)  # partial last row-tile handled by masked writeback

    out = pl.pallas_call(
        kernel,
        out_shape=jax.ShapeDtypeStruct((rows, Hp), x.dtype),
        grid_spec=pltpu.PrefetchScalarGridSpec(
            num_scalar_prefetch=0,
            grid=grid,
            in_specs=[
                pl.BlockSpec((block_rows, Hp), lambda i: (i, 0)),
                pl.BlockSpec((1, Hp), lambda i: (0, 0)),
                pl.BlockSpec((1, Hp), lambda i: (0, 0)),
            ],
            out_specs=pl.BlockSpec((block_rows, Hp), lambda i: (i, 0)),
        ),
        compiler_params=pltpu.CompilerParams(
            dimension_semantics=("parallel",),
            vmem_limit_bytes=vmem_limit,
        ),
    )(x2, w2, b2)

    if Hp != H:
        out = out[:, :H]
    return out.reshape(orig_shape)


def _reference(x, weight, bias, eps):
    mean = jnp.mean(x, axis=-1, keepdims=True)
    cx = x - mean
    var = jnp.mean(cx * cx, axis=-1, keepdims=True)
    return weight * (cx / jnp.sqrt(var + eps)) + bias


if __name__ == "__main__":
    # Module config: dim=-1, affine_shape=hidden, eps=1e-5
    eps = 1e-5
    key = jax.random.PRNGKey(0)
    k1, k2, k3 = jax.random.split(key, 3)

    # Case 1: small, lane-aligned shape (batch=2, seq=8, hidden=128).
    batch, seq, hidden = 2, 8, 128
    x = jax.random.normal(k1, (batch, seq, hidden), dtype=jnp.float32)
    weight = jnp.full((hidden,), 0.1, dtype=jnp.float32)   # per _reset_parameters
    bias = jnp.zeros((hidden,), dtype=jnp.float32)

    y = layer_norm(x, weight, bias, eps=eps)
    y = jax.block_until_ready(y)
    ref = _reference(x, weight, bias, eps)
    assert jnp.allclose(y, ref, atol=1e-5, rtol=1e-5), "mismatch vs reference (case 1)"

    # Case 2: rows not divisible by block_rows (cdiv grid + masked partial row tile).
    x2 = jax.random.normal(k2, (3, 5, hidden), dtype=jnp.float32)
    y2 = layer_norm(x2, weight, bias, eps=eps)
    y2 = jax.block_until_ready(y2)
    ref2 = _reference(x2, weight, bias, eps)
    assert jnp.allclose(y2, ref2, atol=1e-5, rtol=1e-5), "mismatch vs reference (case 2)"

    # Case 3: hidden not a multiple of 128 (exercises lane-dense padding path).
    hidden3 = 96
    x3 = jax.random.normal(k3, (2, 7, hidden3), dtype=jnp.float32)
    w3 = jnp.full((hidden3,), 0.1, dtype=jnp.float32)
    b3 = jnp.zeros((hidden3,), dtype=jnp.float32)
    y3 = layer_norm(x3, w3, b3, eps=eps)
    y3 = jax.block_until_ready(y3)
    ref3 = _reference(x3, w3, b3, eps)
    assert jnp.allclose(y3, ref3, atol=1e-5, rtol=1e-5), "mismatch vs reference (case 3)"

    print("KERNEL_OK")
</pallas_src>

<mosaic_0001>
module attributes {stable_mosaic.version = 11 : i64} {
  func.func @_layernorm_kernel(%arg0: i32, %arg1: memref<8x128xf32, #tpu.memory_space<vmem>>, %arg2: memref<1x128xf32, #tpu.memory_space<vmem>>, %arg3: memref<1x128xf32, #tpu.memory_space<vmem>>, %arg4: memref<8x128xf32, #tpu.memory_space<vmem>>) attributes {dimension_semantics = [#tpu.dimension_semantics<parallel>], iteration_bounds = array<i64: 2>, scalar_prefetch = 0 : i64, scratch_operands = 0 : i64, tpu.core_type = #tpu.core_type<tc>, window_params = [{transform_indices = @transform_0, window_bounds = array<i64: 8, 128>}, {pipeline_mode = #tpu.pipeline_mode<synchronous>, transform_indices = @transform_1, window_bounds = array<i64: 1, 128>}, {pipeline_mode = #tpu.pipeline_mode<synchronous>, transform_indices = @transform_2, window_bounds = array<i64: 1, 128>}, {transform_indices = @transform_3, window_bounds = array<i64: 8, 128>}]} {
    %c0 = arith.constant 0 : index
    %c0_0 = arith.constant 0 : index
    %0 = vector.load %arg1[%c0, %c0_0] : memref<8x128xf32, #tpu.memory_space<vmem>>, vector<8x128xf32>
    %cst = arith.constant dense<0.000000e+00> : vector<8xf32>
    %1 = vector.multi_reduction <add>, %0, %cst [1] : vector<8x128xf32> to vector<8xf32>
    %2 = vector.shape_cast %1 : vector<8xf32> to vector<8x1xf32>
    %3 = arith.mulf %0, %0 : vector<8x128xf32>
    %cst_1 = arith.constant dense<0.000000e+00> : vector<8xf32>
    %4 = vector.multi_reduction <add>, %3, %cst_1 [1] : vector<8x128xf32> to vector<8xf32>
    %5 = vector.shape_cast %4 : vector<8xf32> to vector<8x1xf32>
    %cst_2 = arith.constant 7.812500e-03 : f32
    %6 = vector.broadcast %cst_2 : f32 to vector<8x1xf32>
    %7 = arith.mulf %2, %6 : vector<8x1xf32>
    %cst_3 = arith.constant 7.812500e-03 : f32
    %8 = vector.broadcast %cst_3 : f32 to vector<8x1xf32>
    %9 = arith.mulf %5, %8 : vector<8x1xf32>
    %10 = arith.mulf %7, %7 : vector<8x1xf32>
    %11 = arith.subf %9, %10 : vector<8x1xf32>
    %cst_4 = arith.constant 0.000000e+00 : f32
    %12 = vector.broadcast %cst_4 : f32 to vector<8x1xf32>
    %13 = arith.maximumf %11, %12 : vector<8x1xf32>
    %cst_5 = arith.constant 9.99999974E-6 : f32
    %14 = vector.broadcast %cst_5 : f32 to vector<8x1xf32>
    %15 = arith.addf %13, %14 : vector<8x1xf32>
    %16 = math.rsqrt %15 : vector<8x1xf32>
    %17 = vector.broadcast %16 : vector<8x1xf32> to vector<8x128xf32>
    %18 = arith.mulf %0, %17 : vector<8x128xf32>
    %cst_6 = arith.constant 0.000000e+00 : f32
    %19 = vector.broadcast %cst_6 : f32 to vector<8x1xf32>
    %20 = arith.subf %19, %7 : vector<8x1xf32>
    %21 = arith.mulf %20, %16 : vector<8x1xf32>
    %22 = vector.broadcast %21 : vector<8x1xf32> to vector<8x128xf32>
    %23 = arith.addf %18, %22 : vector<8x128xf32>
    %c0_7 = arith.constant 0 : index
    %c0_8 = arith.constant 0 : index
    %24 = vector.load %arg2[%c0_7, %c0_8] : memref<1x128xf32, #tpu.memory_space<vmem>>, vector<1x128xf32>
    %25 = vector.broadcast %24 : vector<1x128xf32> to vector<8x128xf32>
    %26 = arith.mulf %25, %23 : vector<8x128xf32>
    %c0_9 = arith.constant 0 : index
    %c0_10 = arith.constant 0 : index
    %27 = vector.load %arg3[%c0_9, %c0_10] : memref<1x128xf32, #tpu.memory_space<vmem>>, vector<1x128xf32>
    %28 = vector.broadcast %27 : vector<1x128xf32> to vector<8x128xf32>
    %29 = arith.addf %26, %28 : vector<8x128xf32>
    %c0_11 = arith.constant 0 : index
    %c0_12 = arith.constant 0 : index
    %30 = vector.load %arg4[%c0_11, %c0_12] : memref<8x128xf32, #tpu.memory_space<vmem>>, vector<8x128xf32>
    tpu.vector_store %arg4[%c0_11, %c0_12], %29 {strides = array<i32>} : memref<8x128xf32, #tpu.memory_space<vmem>>, vector<8x128xf32>,
    return
  }
  func.func @transform_0(%arg0: i32) -> (i32, i32) {
    %c0_i32 = arith.constant 0 : i32
    %c0_i32_0 = arith.constant 0 : i32
    return %arg0, %c0_i32 : i32, i32
  }
  func.func @transform_1(%arg0: i32) -> (i32, i32) {
    %c0_i32 = arith.constant 0 : i32
    %c0_i32_0 = arith.constant 0 : i32
    %c0_i32_1 = arith.constant 0 : i32
    return %c0_i32, %c0_i32_0 : i32, i32
  }
  func.func @transform_2(%arg0: i32) -> (i32, i32) {
    %c0_i32 = arith.constant 0 : i32
    %c0_i32_0 = arith.constant 0 : i32
    %c0_i32_1 = arith.constant 0 : i32
    return %c0_i32, %c0_i32_0 : i32, i32
  }
  func.func @transform_3(%arg0: i32) -> (i32, i32) {
    %c0_i32 = arith.constant 0 : i32
    %c0_i32_0 = arith.constant 0 : i32
    return %arg0, %c0_i32 : i32, i32
  }
}

</mosaic_0001>

<bundles_post_ra>
// kernel: tpu_custom_call.1
= control target key start
LH: loop header
LB: loop body
LE: loop exit
PB: predicated region body
PF: predicated region fallthrough
CT: control target
= control target key end

     0   :  { %8 = vsyncpa [#allocation3], 0  ;;  %s709_s0 = inlined_call_operand.hbm [shape: f32[16,128], index: 0, kind: input, shape index: {}]   ;;  %s710_s1 = inlined_call_operand.hbm [shape: f32[1,128], index: 1, kind: input, shape index: {}]   ;;  %s711_s2 = inlined_call_operand.vmem [shape: f32[1,128], index: 2, kind: input, shape index: {}]   ;;  %s712_s3 = inlined_call_operand.hbm [shape: f32[16,128], index: 3, kind: output, shape index: {}]  }
   0x1   :  { %10 = vsyncpa [#allocation3 + $0x1], 0 }
   0x2   :  { %11 = vsyncpa [#allocation6], 0 }
   0x3   :  { %12 = vsyncpa [#allocation4], 0 }
   0x4   :  { %14 = vsyncpa [#allocation4 + $0x1], 0  ;;  %s564_s12 = smov 0   ;;  %s566_s13 = smov 0  }
   0x5   :  { %s568_s14 = smov 0   ;;  %s570_s15 = smov 0  }
   0x6 LB: > { %s585_s16 = sadd.s32 4294967295, %s541_s15   ;;  %s336_s17 = sadd.s32 4294967294, %s541_s15   ;;  %s541_s15 = sphi %s570_s15, %s722_s15   ;;  %s537_s14 = sphi %s568_s14, %s721_s14   ;;  %s533_s13 = sphi %s566_s13, %s720_s13   ;;  %s529_s12 = sphi %s564_s12, %s719_s12  }
   0x7   : > { %p40_p0 = scmp.ne.s32.totalorder %s533_s13, %s529_s12  ;;  %p41_p1 = scmp.eq.s32.totalorder %s585_s16, 0 }
   0x8   : > { %p106_p2 = scmp.eq.s32.totalorder %s585_s16, 1  ;;  %p112_p3 = scmp.eq.s32.totalorder %s336_s17, 1 }
   0x9   : > { %p594_p4 = por %p41_p1, %p40_p0  ;;  %p337_p5 = scmp.ge.s32.totalorder %s541_s15, 1 }
   0xa   : > { %p599_p6 = por %p112_p3, %p40_p0  ;;  %p119_p7 = scmp.lt.s32.totalorder %s541_s15, 3 }
   0xb   : > { %s131_s22 = sshll.u32 %s710_s1, 4  ;;  %s543_s24 = smov [#allocation5]   ;;  %s132_s22 = int_to_ptr.hbm [resolvable:$true] %s131_s22 }
   0xc   : > { %p607_p8 = pnand %p337_p5, %p119_p7  ;;  %s133_s25 = sshll.u32 %s543_s24, 4  ;;  %s134_s25 = int_to_ptr.vmem [resolvable:$true] %s133_s25 }
   0xd   : > { %s617_s26 = sadd.s32 1, %s541_s15   ;;  %s27_s27 = sadd.s32 1, %s537_s14 }
   0xe   : > { %p358_p10 = pneg %p607_p8  ;;  %s24_s28 = ssub.s32 %s541_s15, %s617_s26 }
   0xf   : > { %p25_p12 = scmp.eq.s32.totalorder %s24_s28, 0  ;;  %p34_p13 = scmp.ne.s32.totalorder %s537_s14, %s533_s13 }
  0x10   : > { %p359_p11 = pnand %p358_p10, %p41_p1  ;;  %p35_p0 = scmp.eq.s32.totalorder %s541_s15, 0 }
  0x11   : > { %s626_s29 = scalar_select %p25_p12, %s537_s14, %s27_s27  }
  0x12   : > { %361 = dma.hbm_to_vmem [thread:$0]  (!%p359_p11), %s132_s22, 16, %s134_s25, [#allocation6]  }
  0x13   : > { %p630_p3 = por %p106_p2, %p34_p13  ;;  %p371_p5 = scmp.lt.s32.totalorder %s541_s15, 2 }
  0x14   : > { %s147_s4 = sand.u32 1, %s537_s14   ;;  %s341_s5 = sshll.u32 %s541_s15, 3 }
  0x15   : > { %p36_p7 = por %p35_p0, %p34_p13  ;;  %s340_s6 = sshll.u32 %s147_s4, 3 }
  0x16   : > { %s155_s9 = scalar_lea.hbm %s709_s0, %s341_s5  ;;  %s151_s11 = scalar_lea.vmem [#allocation2], %s340_s6 }
  0x17   : > { %s157_s10 = sshll.u32 %s155_s9, 4  ;;  %s159_s17 = sshll.u32 %s151_s11, 4  ;;  %s158_s10 = int_to_ptr.hbm [resolvable:$true] %s157_s10  ;;  %s160_s17 = int_to_ptr.vmem [resolvable:$true] %s159_s17 }
  0x18   : > { %p640_p10 = pnand %p371_p5, %p36_p7  ;;  %s148_s21 = scalar_lea.sflag [#allocation3], %s147_s4 }
  0x19   : > { %s441_s22 = sshra.s32 %s158_s10, 4  ;;  %s448_s28 = scalar_lea.hbm %s709_s0, 16  ;;  %s442_s22 = int_to_ptr.hbm [resolvable:$true] %s441_s22 }
  0x1a   : > { %s443_s24 = scalar_lea.hbm %s442_s22, 8  ;;  %p445_p11 = pneg %p640_p10 }
  0x1b   : > { %p444_p2 = scmp.ne.s32.totalorder %s442_s22, %s443_s24  ;;  %p449_p0 = scmp.lt.s32.totalorder %s442_s22, %s709_s0 }
  0x1c   : > { %p450_p5 = scmp.lt.s32.totalorder %s448_s28, %s443_s24 }
  0x1d   : > { %p446_p12 = pnand %p445_p11, %p444_p2 }
  0x1e   : > { %p451_p7 = por %p450_p5, %p449_p0 }
  0x1f   : > { %p447_p13 = pneg %p446_p12 }
  0x21   : > { %p452_p9 = pnand %p451_p7, %p447_p13 }
  0x23   : > { %455 = shalt.err (!%p452_p9)
}
  0x24   : > { %365 = dma.hbm_to_vmem [thread:$0]  (!%p640_p10), %s158_s10, 128, %s160_s17, %s148_s21  }
  0x25   : > { %168 = sbr.rel (%p607_p8) target bundleno = 207 (0xcf), region = 32  ;;  %s657_s4 = sand.u32 (!%p607_p8), 1, %s533_s13  }
  0x26   : > { %s343_s7 = sshll.u32 (!%p607_p8), %s657_s4, 3  ;;  %s171_s8 = scalar_lea.sflag (!%p607_p8), [#allocation3], %s657_s4 }
  0x27   : > { %s174_s9 = scalar_lea.vmem (!%p607_p8), [#allocation2], %s343_s7 }
  0x2a   : > { %516 = dma.done.wait (%p594_p4), %s171_s8, 128  }
  0x2b   : > { %518 = vsyncadd (%p594_p4), %s171_s8, 4294967168 }
  0x2c   : > { %520 = dma.done.wait (%p41_p1), [#allocation6], 16  }
  0x2d   : > { %522 = vsyncadd (%p41_p1), [#allocation6], 4294967280  ;;  %v203_v0 = vld [vmem:[%s174_s9] sm:$0xff]  ;;  %s347_s18 = sshll.u32 %s585_s16, 3  ;;  %v407_v20 = vld [vmem:[#allocation5] ss:$0 sm:$0xff] }
  0x2e   : > { %204 = vadd.xlane.f32.xlu0 %v203_v0  ;;  %v206_v1 = vmul.f32 %v203_v0, %v203_v0  ;;  %s251_s11 = scalar_lea.hbm %s712_s3, %s347_s18  ;;  %v408_v22 = vld [vmem:[%s711_s2] ss:$0 sm:$0xff]  ;;  %s202_s21 = scalar_lea.vmem [#allocation7], %s343_s7 }
  0x2f   : > { %s253_s16 = sshll.u32 %s202_s21, 4  ;;  %s255_s22 = sshll.u32 %s251_s11, 4  ;;  %s254_s16 = int_to_ptr.vmem [resolvable:$true] %s253_s16  ;;  %s256_s22 = int_to_ptr.hbm [resolvable:$true] %s255_s22 }
  0x30   : > { %s241_s24 = scalar_lea.sflag [#allocation4], %s657_s4  ;;  %s485_s25 = sshra.s32 %s256_s22, 4  ;;  %s486_s25 = int_to_ptr.hbm [resolvable:$true] %s485_s25 }
  0x31   : > { %s487_s27 = scalar_lea.hbm %s486_s25, 8  ;;  %s491_s6 = scalar_lea.hbm %s712_s3, 16 }
  0x32   : > { %p488_p1 = scmp.ne.s32.totalorder %s486_s25, %s487_s27  ;;  %p492_p9 = scmp.lt.s32.totalorder %s486_s25, %s712_s3 }
  0x33   : > { %p493_p10 = scmp.lt.s32.totalorder %s491_s6, %s487_s27 }
  0x34   : > { %p489_p4 = pnand %p488_p1, %p630_p3 }
  0x35   : > { %p494_p2 = por %p493_p10, %p492_p9 }
  0x36   : > { %207 = vadd.xlane.f32.xlu0 %v206_v1  ;;  %p490_p8 = pneg %p489_p4 }
  0x38   : > { %p495_p11 = pnand %p494_p2, %p490_p8 }
  0xa1   : > { %v205_v2 = vpop.xlane.xlu0 %204 }
  0xa2   : > { %v209_v3 = vmul.f32 0.0078125, %v205_v2 }
  0xa4   : > { %v211_v5 = vmul.f32 %v209_v3, %v209_v3  ;;  %v226_v16 = vsub.f32 0.0, %v209_v3 }
  0xa9   : > { %v208_v4 = vpop.xlane.xlu0 %207 }
  0xaa   : > { %v210_v6 = vmul.f32 0.0078125, %v208_v4 }
  0xac   : > { %v212_v7 = vsub.f32 %v210_v6, %v211_v5 }
  0xae   : > { %v213_v8 = vmax.f32 %v212_v7, 0.0 }
  0xb0   : > { %v214_v9 = vadd.f32 1e-05, %v213_v8 }
  0xb2   : > { %409 = vrsqrt.f32 %v214_v9  ;;  %vm221_vm1 = vweird.f32 %v214_v9 }
  0xb8   : > { %v410_v10 = vpop.eup %409 }
  0xb9   : > { %v216_v11 = vmul.f32 %v410_v10, %v214_v9  ;;  %vm222_vm0 = vweird.f32 %v410_v10 }
  0xba   : > { %vm223_vm2 = vmor %vm221_vm1, %vm222_vm0 }
  0xbb   : > { %v217_v12 = vmul.f32 %v410_v10, %v216_v11 }
  0xbd   : > { %v218_v13 = vmul.f32 0.5, %v217_v12 }
  0xbf   : > { %v219_v14 = vsub.f32 1.5, %v218_v13 }
  0xc1   : > { %v220_v15 = vmul.f32 %v410_v10, %v219_v14 }
  0xc3   : > { %v224_v17 = vsel %vm223_vm2, %v410_v10, %v220_v15 }
  0xc4   : > { %v225_v18 = vmul.f32 %v224_v17, %v203_v0  ;;  %v227_v19 = vmul.f32 %v226_v16, %v224_v17 }
  0xc6   : > { %v228_v21 = vadd.f32 %v227_v19, %v225_v18 }
  0xc8   : > { %v233_v23 = vmul.f32 %v407_v20, %v228_v21 }
  0xca   : > { %v238_v24 = vadd.f32 %v408_v22, %v233_v23 }
  0xcc   : > { %239 = vst [vmem:[%s202_s21] sm:$0xff] %v238_v24 }
  0xcd   : > { %498 = shalt.err (!%p495_p11)
}
  0xce   : > { %356 = dma.vmem_to_hbm [thread:$0]  (%p630_p3), %s254_s16, 128, %s256_s22, %s241_s24  }
  0xcf PF: > { %s267_s4 = sand.u32 1, %s529_s12   ;;  %p718_p12 = scmp.ge.s32.totalorder %s541_s15, 2 }
  0xd0   : > { %s268_s9 = scalar_lea.sflag [#allocation4], %s267_s4 }
  0xd1   : > { %p367_p13 = pnand %p718_p12, %p599_p6 }
  0xd3   : > { %p368_p0 = pneg %p367_p13 }
  0xd5   : > { %524 = dma.done.wait (%p368_p0), %s268_s9, 128  }
  0xd6   : > { %526 = vsyncadd (%p368_p0), %s268_s9, 4294967168  ;;  %p17_p5 = scmp.ge.s32.totalorder %s617_s26, 4   ;;  %s719_s12 = smov %s533_s13 }
  0xd7   : > { %s720_s13 = smov %s537_s14  ;;  %s721_s14 = smov %s626_s29 }
  0xd8   : > { %s722_s15 = smov %s617_s26  ;;  %19 = sbr.rel (!%p17_p5) target bundleno = 6 (0x6), region = 81 }
  0xdd   :  { %274 = vsyncpa [#allocation3], 1 }
  0xde   :  { %276 = vsyncpa [#allocation3 + $0x1], 1 }
  0xdf   :  { %277 = vsyncpa [#allocation6], 1 }
  0xe0   :  { %278 = vsyncpa [#allocation4], 1 }
  0xe1   :  { %280 = vsyncpa [#allocation4 + $0x1], 1 }

</bundles_post_ra>
